<compile_context>
chip_gen: v6e
topology: v6e:2x2x1
jax: 0.10.0
libtpu: 0.0.40
codegen_flags: <defaults>
</compile_context>

<pallas_src>
import jax
import jax.numpy as jnp
from jax.experimental import pallas as pl
from jax.experimental.pallas import tpu as pltpu

_LANES = 128                        # vreg lane width — last dim of every block
_MAX_TILE_BYTES = 2 * 1024 * 1024   # ~2 MiB per tile (x4 double-buffered <= 8 MiB VMEM)
_SPLIT_MIN_BYTES = 2 * 1024 * 1024  # only split a single-tile slab for megacore if >= this


def _copy_kernel(x_ref, o_ref):
    # One lane-dense tile (or the whole small array) per grid step.
    o_ref[...] = x_ref[...]


def _align_up(x: int, m: int) -> int:
    return ((x + m - 1) // m) * m


def _cdiv(a: int, b: int) -> int:
    return -(-a // b)


def _tile_rows_and_grid(rows: int, itemsize: int):
    """Pick (tile_rows, num_tiles) for a (rows, 128) lane-dense slab."""
    sublanes = 8 * max(1, 4 // itemsize)          # 8 f32, 16 bf16, 32 int8/fp8
    cap = max(sublanes,
              (_MAX_TILE_BYTES // (_LANES * itemsize)) // sublanes * sublanes)
    row_bytes = _LANES * itemsize

    if rows <= cap:
        if rows * row_bytes >= _SPLIT_MIN_BYTES and rows >= 2 * sublanes:
            # Large single-tile slab: split into 2 so the "parallel" axis can
            # shard across v7x's 2 TensorCores (gated on size — pure overhead
            # for tiny inputs / single-TC v5e & v6e).
            tile_rows = _align_up(_cdiv(rows, 2), sublanes)
            return tile_rows, _cdiv(rows, tile_rows)
        # One block equal to the full array extent (no (8,128) divisibility
        # requirement in that case).
        return rows, 1

    tile_rows = cap
    num_tiles = _cdiv(rows, tile_rows)
    if num_tiles % 2 == 1:
        # v7x megacore balance: prefer an even tile count.
        num_tiles += 1
        tile_rows = _align_up(_cdiv(rows, num_tiles), sublanes)
        num_tiles = _cdiv(rows, tile_rows)
    return tile_rows, num_tiles


def backbone_passthrough(x_nchw: jax.Array) -> jax.Array:
    """Pallas lane-dense pass-through of an NCHW feature map (bit-exact copy)."""
    shape = x_nchw.shape
    dtype = x_nchw.dtype
    itemsize = x_nchw.dtype.itemsize
    total = 1
    for d in shape:
        total *= int(d)

    cost = pl.CostEstimate(flops=0, transcendentals=0,
                           bytes_accessed=2 * total * itemsize)

    if total % _LANES != 0:
        if total * itemsize <= _MAX_TILE_BYTES:
            # Small non-lane-aligned input: single whole-array block in its
            # native shape — no pad / slice HBM passes at all.
            return pl.pallas_call(
                _copy_kernel,
                out_shape=jax.ShapeDtypeStruct(shape, dtype),
                cost_estimate=cost,
            )(x_nchw)
        # TODO(synk): large non-128-multiple inputs still pay one pad pass and
        # one slice pass outside the kernel; a masked in-kernel tail copy would
        # remove them. Not exercised by the backbone contract's typical shapes.
        rows = _cdiv(total, _LANES)
        pad = rows * _LANES - total
        flat = jnp.pad(x_nchw.reshape(-1), (0, pad))
    else:
        rows = total // _LANES
        pad = 0
        flat = x_nchw.reshape(-1)

    x2d = flat.reshape(rows, _LANES)
    tile_rows, num_tiles = _tile_rows_and_grid(rows, itemsize)

    out2d = pl.pallas_call(
        _copy_kernel,
        out_shape=jax.ShapeDtypeStruct((rows, _LANES), dtype),
        grid=(num_tiles,),
        in_specs=[pl.BlockSpec((tile_rows, _LANES), lambda i: (i, 0))],
        out_specs=pl.BlockSpec((tile_rows, _LANES), lambda i: (i, 0)),
        compiler_params=pltpu.CompilerParams(
            dimension_semantics=("parallel",),
        ),
        cost_estimate=cost,
    )(x2d)

    out_flat = out2d.reshape(-1)
    if pad:
        out_flat = out_flat[:total]
    return out_flat.reshape(shape)


class BaseBackbone:
    """Superclass of Replaceable Backbone Model for Semantic Estimation (JAX/Pallas)."""

    def __init__(self, in_channels: int):
        self.in_channels = in_channels
        self.model = None
        self.enc_channels = []

    def forward(self, x):
        # Mirrors the PyTorch reference exactly.
        raise NotImplementedError

    def load_pretrained_ckpt(self):
        # Synthetic kernel — no checkpoint loading.
        raise NotImplementedError

    def __call__(self, x):
        return self.forward(x)


class IdentityBackbone(BaseBackbone):
    """Minimal concrete backbone exercising the Pallas hot path."""

    def __init__(self, in_channels: int):
        super().__init__(in_channels)
        self.enc_channels = [in_channels]

    def forward(self, x):
        assert x.shape[1] == self.in_channels, (
            f"expected {self.in_channels} channels, got {x.shape[1]}"
        )
        return backbone_passthrough(x)


if __name__ == "__main__":
    key = jax.random.PRNGKey(0)
    N, C, H, W = 2, 4, 16, 16  # NCHW, matching PyTorch conv-input convention
    x = jax.random.normal(key, (N, C, H, W), dtype=jnp.float32)

    # The abstract base still raises, like the reference.
    base = BaseBackbone(in_channels=C)
    try:
        base(x)
        raise AssertionError("BaseBackbone.forward should raise NotImplementedError")
    except NotImplementedError:
        pass

    # Concrete subclass runs the Pallas kernel (lane-dense, single-tile path).
    backbone = IdentityBackbone(in_channels=C)
    y = jax.block_until_ready(backbone(x))
    assert y.shape == x.shape and y.dtype == x.dtype
    assert bool(jnp.allclose(y, x))

    # Small non-128-multiple total: whole-array single-block path (no pad/slice).
    x_odd = jax.random.normal(jax.random.PRNGKey(1), (1, 3, 5, 7), jnp.float32)
    y_odd = jax.block_until_ready(backbone_passthrough(x_odd))
    assert y_odd.shape == x_odd.shape
    assert bool(jnp.allclose(y_odd, x_odd))

    # Larger feature map: multi-tile, even tile count, ragged final block.
    x_big = jax.random.normal(jax.random.PRNGKey(2), (1, 2, 625, 512), jnp.float32)
    y_big = jax.block_until_ready(backbone_passthrough(x_big))
    assert y_big.shape == x_big.shape
    assert bool(jnp.allclose(y_big, x_big))

    print("KERNEL_OK")
</pallas_src>

<mosaic_0001>
module attributes {stable_mosaic.version = 11 : i64} {
  func.func @_copy_kernel(%arg0: i32, %arg1: memref<16x128xf32, #tpu.memory_space<vmem>>, %arg2: memref<16x128xf32, #tpu.memory_space<vmem>>) attributes {dimension_semantics = [#tpu.dimension_semantics<parallel>], iteration_bounds = array<i64: 1>, scalar_prefetch = 0 : i64, scratch_operands = 0 : i64, tpu.core_type = #tpu.core_type<tc>, window_params = [{transform_indices = @transform_0, window_bounds = array<i64: 16, 128>}, {transform_indices = @transform_1, window_bounds = array<i64: 16, 128>}]} {
    %c0 = arith.constant 0 : index
    %c0_0 = arith.constant 0 : index
    %0 = vector.load %arg1[%c0, %c0_0] : memref<16x128xf32, #tpu.memory_space<vmem>>, vector<16x128xf32>
    %c0_1 = arith.constant 0 : index
    %c0_2 = arith.constant 0 : index
    %1 = vector.load %arg2[%c0_1, %c0_2] : memref<16x128xf32, #tpu.memory_space<vmem>>, vector<16x128xf32>
    tpu.vector_store %arg2[%c0_1, %c0_2], %0 {strides = array<i32>} : memref<16x128xf32, #tpu.memory_space<vmem>>, vector<16x128xf32>,
    return
  }
  func.func @transform_0(%arg0: i32) -> (i32, i32) {
    %c0_i32 = arith.constant 0 : i32
    %c0_i32_0 = arith.constant 0 : i32
    return %arg0, %c0_i32 : i32, i32
  }
  func.func @transform_1(%arg0: i32) -> (i32, i32) {
    %c0_i32 = arith.constant 0 : i32
    %c0_i32_0 = arith.constant 0 : i32
    return %arg0, %c0_i32 : i32, i32
  }
}

</mosaic_0001>

<bundles_post_ra>
// kernel: tpu_custom_call.1
= control target key start
LH: loop header
LB: loop body
LE: loop exit
PB: predicated region body
PF: predicated region fallthrough
CT: control target
= control target key end

     0   :  { %6 = vsyncpa [#allocation3], 0  ;;  %s112_s0 = inlined_call_operand.hbm [shape: f32[16,128], index: 0, kind: input, shape index: {}]   ;;  %s113_s1 = inlined_call_operand.hbm [shape: f32[16,128], index: 1, kind: output, shape index: {}]  }
   0x1   :  { %7 = vsyncpa [#allocation4], 0  ;;  %s92_s6 = smov [#allocation2]  }
   0x2   :  { %s13_s7 = sshll.u32 %s92_s6, 4  ;;  %s14_s7 = int_to_ptr.vmem [resolvable:$true] %s13_s7 }
   0x3   :  { %s56_s8 = scalar_lea.vmem %s14_s7, 256  ;;  %p61_p1 = scmp.lt.s32.totalorder %s14_s7, %s14_s7 }
   0x4   :  { %p57_p0 = scmp.ne.s32.totalorder %s14_s7, %s56_s8  ;;  %p62_p2 = scmp.lt.s32.totalorder %s56_s8, %s56_s8 }
   0x6   :  { %p63_p3 = por %p62_p2, %p61_p1 }
   0x8   :  { %p64_p4 = pnand %p63_p3, %p57_p0 }
   0xa   :  { %67 = shalt.err (!%p64_p4)
}
   0xb   :  { %s93_s9 = smov 128   ;;  %s94_s10 = smov 8  }
   0xc   :  { %19 = dma.hbm_to_vmem [thread:$0]  %s112_s0, 256, %s14_s7, [#allocation3], %s93_s9, %s93_s9, %s94_s10  }
   0xd   :  { %88 = dma.done.wait [#allocation3], 256  }
   0xe   :  { %89 = vsyncadd [#allocation3], 4294967040  ;;  %s95_s13 = smov [#allocation5]   ;;  %v23_v0 = vld [vmem:[#allocation2] sm:$0xff]  ;;  %v24_v1 = vld [vmem:[#allocation2 + $0x8] sm:$0xff] }
   0xf   :  { %s32_s14 = sshll.u32 %s95_s13, 4  ;;  %25 = vst [vmem:[#allocation5] sm:$0xff] %v23_v0  ;;  %26 = vst [vmem:[#allocation5 + $0x8] sm:$0xff] %v24_v1  ;;  %s33_s14 = int_to_ptr.vmem [resolvable:$true] %s32_s14 }
  0x10   :  { %s68_s15 = scalar_lea.vmem %s33_s14, 256  ;;  %p73_p6 = scmp.lt.s32.totalorder %s33_s14, %s33_s14 }
  0x11   :  { %p69_p5 = scmp.ne.s32.totalorder %s33_s14, %s68_s15  ;;  %p74_p7 = scmp.lt.s32.totalorder %s68_s15, %s68_s15 }
  0x13   :  { %p75_p8 = por %p74_p7, %p73_p6 }
  0x15   :  { %p76_p9 = pnand %p75_p8, %p69_p5 }
  0x17   :  { %79 = shalt.err (!%p76_p9)
}
  0x18   :  { %38 = dma.vmem_to_hbm [thread:$0]  %s33_s14, 256, %s113_s1, [#allocation4], %s93_s9, %s93_s9, %s94_s10  }
  0x19   :  { %90 = dma.done.wait [#allocation4], 256  }
  0x1a   :  { %91 = vsyncadd [#allocation4], 4294967040 }
  0x1b   :  { %42 = vsyncpa [#allocation3], 1 }
  0x1c   :  { %43 = vsyncpa [#allocation4], 1 }

</bundles_post_ra>
